<compile_context>
chip_gen: v5e
topology: v5e:2x2
jax: 0.10.0
libtpu: 0.0.40
codegen_flags: <defaults>
</compile_context>

<pallas_src>
import functools

import jax
import jax.numpy as jnp
from jax.experimental import pallas as pl
from jax.experimental.pallas import tpu as pltpu


def _attention_kernel(x_ref, gamma_ref, beta_ref, wq_ref, wk_ref, wv_ref,
                      wo_ref, o_ref, xn_ref, acc_ref, *, scale, eps):
    """One grid step = one (batch, head) pair. Head axis is the reduction."""
    h = pl.program_id(1)
    num_heads = pl.num_programs(1)
    cdt = x_ref.dtype                      # compute dtype for MXU operands

    @pl.when(h == 0)
    def _():
        # LayerNorm once per batch element (statistics in f32), cached in VMEM.
        xf = x_ref[...].astype(jnp.float32)                      # (N, E)
        mean = jnp.mean(xf, axis=-1, keepdims=True)
        var = jnp.mean((xf - mean) ** 2, axis=-1, keepdims=True)
        xn = (xf - mean) * jax.lax.rsqrt(var + eps)
        xn = xn * gamma_ref[0].astype(jnp.float32) + beta_ref[0].astype(jnp.float32)
        xn_ref[...] = xn.astype(cdt)
        acc_ref[...] = jnp.zeros_like(acc_ref)

    xn = xn_ref[...]                                             # (N, E), native dtype

    # Per-head projections; weights arrive already head-sliced via BlockSpec.
    # Fold the softmax scale into q (N*D muls instead of N*N). Results pop
    # from the MXU directly in the compute dtype (internal f32 accumulation).
    q = jnp.dot(xn, wq_ref[...], preferred_element_type=cdt) * scale
    k = jnp.dot(xn, wk_ref[...], preferred_element_type=cdt)
    v = jnp.dot(xn, wv_ref[...], preferred_element_type=cdt)

    # Scores: contract the feature dim of q and k (no explicit transpose).
    s = jnp.einsum("nd,md->nm", q, k,
                   preferred_element_type=jnp.float32)           # (N, N) f32

    # Numerically-stable softmax in f32; denominator on the EUP (approx recip).
    # TODO(synk): for long sequences (N >~ 1-2k) tile the kv axis flash-style
    # with online softmax instead of materializing the full (N, N) scores.
    s = s - jnp.max(s, axis=-1, keepdims=True)
    p = jnp.exp(s)
    p = p * pl.reciprocal(jnp.sum(p, axis=-1, keepdims=True), approx=True)

    o_h = jnp.dot(p.astype(cdt), v, preferred_element_type=cdt)  # (N, D)

    # Output projection: accumulate this head's contribution in f32.
    acc_ref[...] += jnp.dot(o_h, wo_ref[...],
                            preferred_element_type=jnp.float32)  # (N, E)

    @pl.when(h == num_heads - 1)
    def _():
        o_ref[...] = acc_ref[...].astype(o_ref.dtype)


def attention_forward(x, gamma, beta, w_qkv, w_out, *, num_heads, d_model,
                      eps=1e-5):
    B, N, E = x.shape
    H, D = num_heads, d_model
    hd = H * D
    assert w_qkv.shape == (E, 3 * hd)
    assert w_out.shape == (hd, E)
    scale = float(D) ** (-0.5)

    # Head-major weight views, built once outside the kernel (column/row order
    # of w_qkv / w_out is (h, d)-major, matching rearrange 'b n (h d) -> b h n d').
    wq = w_qkv[:, 0 * hd:1 * hd].reshape(E, H, D).transpose(1, 0, 2)  # (H, E, D)
    wk = w_qkv[:, 1 * hd:2 * hd].reshape(E, H, D).transpose(1, 0, 2)  # (H, E, D)
    wv = w_qkv[:, 2 * hd:3 * hd].reshape(E, H, D).transpose(1, 0, 2)  # (H, E, D)
    wo = w_out.reshape(H, D, E)                                       # (H, D, E)

    kernel = functools.partial(_attention_kernel, scale=scale, eps=eps)

    itemsize = jnp.dtype(x.dtype).itemsize
    cost = pl.CostEstimate(
        flops=(8 * B * N * E                       # LayerNorm
               + 2 * B * N * E * 3 * hd            # qkv projections
               + 2 * B * H * N * N * D * 2         # scores + p @ v
               + 2 * B * N * hd * E),              # output projection
        transcendentals=B * H * N * N + B * N,     # exp + rsqrt
        bytes_accessed=((B * N * E * 2 + 4 * E * hd) * itemsize + 2 * E * 4),
    )

    return pl.pallas_call(
        kernel,
        out_shape=jax.ShapeDtypeStruct((B, N, E), x.dtype),
        grid_spec=pltpu.PrefetchScalarGridSpec(
            num_scalar_prefetch=0,
            grid=(B, H),                                       # heads = reduction, last
            in_specs=[
                pl.BlockSpec((None, N, E), lambda b, h: (b, 0, 0)),   # x (fetched once per b)
                pl.BlockSpec((1, E), lambda b, h: (0, 0)),            # gamma
                pl.BlockSpec((1, E), lambda b, h: (0, 0)),            # beta
                pl.BlockSpec((None, E, D), lambda b, h: (h, 0, 0)),   # wq  (one head)
                pl.BlockSpec((None, E, D), lambda b, h: (h, 0, 0)),   # wk  (one head)
                pl.BlockSpec((None, E, D), lambda b, h: (h, 0, 0)),   # wv  (one head)
                pl.BlockSpec((None, D, E), lambda b, h: (h, 0, 0)),   # w_out (one head)
            ],
            out_specs=pl.BlockSpec((None, N, E), lambda b, h: (b, 0, 0)),
            scratch_shapes=[
                pltpu.VMEM((N, E), x.dtype),      # cached LayerNorm output for batch b
                pltpu.VMEM((N, E), jnp.float32),  # f32 accumulator for output projection
            ],
        ),
        compiler_params=pltpu.CompilerParams(
            dimension_semantics=("parallel", "arbitrary"),
        ),
        cost_estimate=cost,
    )(x, gamma.reshape(1, E), beta.reshape(1, E), wq, wk, wv, wo)


def attention_reference(x, gamma, beta, w_qkv, w_out, *, num_heads, d_model,
                        eps=1e-5):
    """Pure-JAX reference replicating the PyTorch forward."""
    B, N, E = x.shape
    hd = num_heads * d_model
    scale = float(d_model) ** (-0.5)

    mean = jnp.mean(x, axis=-1, keepdims=True)
    var = jnp.mean((x - mean) ** 2, axis=-1, keepdims=True)
    xn = (x - mean) / jnp.sqrt(var + eps) * gamma + beta

    qkv = xn @ w_qkv                                          # (B, N, 3*H*D)
    q, k, v = jnp.split(qkv, 3, axis=-1)

    def to_heads(t):  # b n (h d) -> b h n d
        return t.reshape(B, N, num_heads, d_model).transpose(0, 2, 1, 3)

    q, k, v = map(to_heads, (q, k, v))
    s = jnp.einsum("bhnd,bhmd->bhnm", q, k) * scale
    p = jax.nn.softmax(s, axis=-1)
    o = jnp.einsum("bhnm,bhmd->bhnd", p, v)
    o = o.transpose(0, 2, 1, 3).reshape(B, N, hd)             # b h n d -> b n (h d)
    return o @ w_out


if __name__ == "__main__":
    # Small shapes consistent with the module's forward.
    B, N = 2, 8                 # batch, sequence length
    embedding_dim = 32
    num_heads = 2
    d_model = 16
    hd = num_heads * d_model

    key = jax.random.PRNGKey(0)
    k_x, k_g, k_b, k_qkv, k_out = jax.random.split(key, 5)

    x = jax.random.normal(k_x, (B, N, embedding_dim), dtype=jnp.float32)
    gamma = 1.0 + 0.1 * jax.random.normal(k_g, (embedding_dim,), dtype=jnp.float32)
    beta = 0.1 * jax.random.normal(k_b, (embedding_dim,), dtype=jnp.float32)
    # Linear weights stored as (in_features, out_features).
    w_qkv = 0.05 * jax.random.normal(k_qkv, (embedding_dim, 3 * hd), dtype=jnp.float32)
    w_out = 0.05 * jax.random.normal(k_out, (hd, embedding_dim), dtype=jnp.float32)

    out = attention_forward(x, gamma, beta, w_qkv, w_out,
                            num_heads=num_heads, d_model=d_model)
    out = jax.block_until_ready(out)

    ref = attention_reference(x, gamma, beta, w_qkv, w_out,
                              num_heads=num_heads, d_model=d_model)
    assert out.shape == (B, N, embedding_dim)
    # Tolerance allows for the approximate (EUP) softmax reciprocal.
    assert jnp.allclose(out, ref, atol=2e-3, rtol=2e-3), "mismatch vs reference"

    print("KERNEL_OK")
</pallas_src>

<mosaic_0001>
module attributes {stable_mosaic.version = 11 : i64} {
  func.func @_attention_kernel(%arg0: i32, %arg1: i32, %arg2: memref<1x8x32xf32, #tpu.memory_space<vmem>>, %arg3: memref<1x32xf32, #tpu.memory_space<vmem>>, %arg4: memref<1x32xf32, #tpu.memory_space<vmem>>, %arg5: memref<1x32x16xf32, #tpu.memory_space<vmem>>, %arg6: memref<1x32x16xf32, #tpu.memory_space<vmem>>, %arg7: memref<1x32x16xf32, #tpu.memory_space<vmem>>, %arg8: memref<1x16x32xf32, #tpu.memory_space<vmem>>, %arg9: memref<1x8x32xf32, #tpu.memory_space<vmem>>, %arg10: memref<8x32xf32, #tpu.memory_space<vmem>>, %arg11: memref<8x32xf32, #tpu.memory_space<vmem>>) attributes {dimension_semantics = [#tpu.dimension_semantics<parallel>, #tpu.dimension_semantics<arbitrary>], iteration_bounds = array<i64: 2, 2>, scalar_prefetch = 0 : i64, scratch_operands = 2 : i64, tpu.core_type = #tpu.core_type<tc>, window_params = [{transform_indices = @transform_0, window_bounds = array<i64: 1, 8, 32>}, {pipeline_mode = #tpu.pipeline_mode<synchronous>, transform_indices = @transform_1, window_bounds = array<i64: 1, 32>}, {pipeline_mode = #tpu.pipeline_mode<synchronous>, transform_indices = @transform_2, window_bounds = array<i64: 1, 32>}, {transform_indices = @transform_3, window_bounds = array<i64: 1, 32, 16>}, {transform_indices = @transform_4, window_bounds = array<i64: 1, 32, 16>}, {transform_indices = @transform_5, window_bounds = array<i64: 1, 32, 16>}, {transform_indices = @transform_6, window_bounds = array<i64: 1, 16, 32>}, {transform_indices = @transform_7, window_bounds = array<i64: 1, 8, 32>}]} {
    %c0_i32 = arith.constant 0 : i32
    %0 = arith.cmpi eq, %arg1, %c0_i32 : i32
    %1 = arith.extui %0 : i1 to i32
    %c0_i32_0 = arith.constant 0 : i32
    %2 = arith.cmpi ne, %1, %c0_i32_0 : i32
    scf.if %2 {
      %c0_27 = arith.constant 0 : index
      %c0_28 = arith.constant 0 : index
      %c0_29 = arith.constant 0 : index
      %36 = vector.load %arg2[%c0_27, %c0_28, %c0_29] : memref<1x8x32xf32, #tpu.memory_space<vmem>>, vector<1x8x32xf32>
      %37 = vector.shape_cast %36 : vector<1x8x32xf32> to vector<8x32xf32>
      %cst_30 = arith.constant dense<0.000000e+00> : vector<8xf32>
      %38 = vector.multi_reduction <add>, %37, %cst_30 [1] : vector<8x32xf32> to vector<8xf32>
      %39 = vector.shape_cast %38 : vector<8xf32> to vector<8x1xf32>
      %cst_31 = arith.constant 3.200000e+01 : f32
      %40 = vector.broadcast %cst_31 : f32 to vector<8x1xf32>
      %41 = arith.divf %39, %40 : vector<8x1xf32>
      %42 = vector.broadcast %41 : vector<8x1xf32> to vector<8x32xf32>
      %43 = arith.subf %37, %42 : vector<8x32xf32>
      %44 = arith.mulf %43, %43 : vector<8x32xf32>
      %cst_32 = arith.constant dense<0.000000e+00> : vector<8xf32>
      %45 = vector.multi_reduction <add>, %44, %cst_32 [1] : vector<8x32xf32> to vector<8xf32>
      %46 = vector.shape_cast %45 : vector<8xf32> to vector<8x1xf32>
      %cst_33 = arith.constant 3.200000e+01 : f32
      %47 = vector.broadcast %cst_33 : f32 to vector<8x1xf32>
      %48 = arith.divf %46, %47 : vector<8x1xf32>
      %49 = vector.broadcast %41 : vector<8x1xf32> to vector<8x32xf32>
      %50 = arith.subf %37, %49 : vector<8x32xf32>
      %cst_34 = arith.constant 9.99999974E-6 : f32
      %51 = vector.broadcast %cst_34 : f32 to vector<8x1xf32>
      %52 = arith.addf %48, %51 : vector<8x1xf32>
      %53 = math.rsqrt %52 : vector<8x1xf32>
      %54 = vector.broadcast %53 : vector<8x1xf32> to vector<8x32xf32>
      %55 = arith.mulf %50, %54 : vector<8x32xf32>
      %c0_35 = arith.constant 0 : index
      %c0_36 = arith.constant 0 : index
      %56 = vector.load %arg3[%c0_35, %c0_36] : memref<1x32xf32, #tpu.memory_space<vmem>>, vector<1x32xf32>
      %57 = vector.shape_cast %56 : vector<1x32xf32> to vector<32xf32>
      %58 = vector.shape_cast %57 : vector<32xf32> to vector<1x32xf32>
      %59 = vector.broadcast %58 : vector<1x32xf32> to vector<8x32xf32>
      %60 = arith.mulf %55, %59 : vector<8x32xf32>
      %c0_37 = arith.constant 0 : index
      %c0_38 = arith.constant 0 : index
      %61 = vector.load %arg4[%c0_37, %c0_38] : memref<1x32xf32, #tpu.memory_space<vmem>>, vector<1x32xf32>
      %62 = vector.shape_cast %61 : vector<1x32xf32> to vector<32xf32>
      %63 = vector.shape_cast %62 : vector<32xf32> to vector<1x32xf32>
      %64 = vector.broadcast %63 : vector<1x32xf32> to vector<8x32xf32>
      %65 = arith.addf %60, %64 : vector<8x32xf32>
      %c0_39 = arith.constant 0 : index
      %c0_40 = arith.constant 0 : index
      %66 = vector.load %arg10[%c0_39, %c0_40] : memref<8x32xf32, #tpu.memory_space<vmem>>, vector<8x32xf32>
      tpu.vector_store %arg10[%c0_39, %c0_40], %65 {strides = array<i32>} : memref<8x32xf32, #tpu.memory_space<vmem>>, vector<8x32xf32>,
      %cst_41 = arith.constant 0.000000e+00 : f32
      %67 = vector.broadcast %cst_41 : f32 to vector<8x32xf32>
      %c0_42 = arith.constant 0 : index
      %c0_43 = arith.constant 0 : index
      %68 = vector.load %arg11[%c0_42, %c0_43] : memref<8x32xf32, #tpu.memory_space<vmem>>, vector<8x32xf32>
      tpu.vector_store %arg11[%c0_42, %c0_43], %67 {strides = array<i32>} : memref<8x32xf32, #tpu.memory_space<vmem>>, vector<8x32xf32>,
    } else {
    }
    %c0 = arith.constant 0 : index
    %c0_1 = arith.constant 0 : index
    %3 = vector.load %arg10[%c0, %c0_1] : memref<8x32xf32, #tpu.memory_space<vmem>>, vector<8x32xf32>
    %c0_2 = arith.constant 0 : index
    %c0_3 = arith.constant 0 : index
    %c0_4 = arith.constant 0 : index
    %4 = vector.load %arg5[%c0_2, %c0_3, %c0_4] : memref<1x32x16xf32, #tpu.memory_space<vmem>>, vector<1x32x16xf32>
    %5 = vector.shape_cast %4 : vector<1x32x16xf32> to vector<32x16xf32>
    %cst = arith.constant dense<0.000000e+00> : vector<8x16xf32>
    %6 = tpu.matmul %3, %5, %cst {dimension_numbers = #tpu.dot_dimension_numbers<[1], [0], [0], [1], [0, 0, 1, 1], [], []>} : vector<8x32xf32>, vector<32x16xf32>, vector<8x16xf32> -> vector<8x16xf32>
    %cst_5 = arith.constant 2.500000e-01 : f32
    %7 = vector.broadcast %cst_5 : f32 to vector<8x16xf32>
    %8 = arith.mulf %6, %7 : vector<8x16xf32>
    %c0_6 = arith.constant 0 : index
    %c0_7 = arith.constant 0 : index
    %c0_8 = arith.constant 0 : index
    %9 = vector.load %arg6[%c0_6, %c0_7, %c0_8] : memref<1x32x16xf32, #tpu.memory_space<vmem>>, vector<1x32x16xf32>
    %10 = vector.shape_cast %9 : vector<1x32x16xf32> to vector<32x16xf32>
    %cst_9 = arith.constant dense<0.000000e+00> : vector<8x16xf32>
    %11 = tpu.matmul %3, %10, %cst_9 {dimension_numbers = #tpu.dot_dimension_numbers<[1], [0], [0], [1], [0, 0, 1, 1], [], []>} : vector<8x32xf32>, vector<32x16xf32>, vector<8x16xf32> -> vector<8x16xf32>
    %c0_10 = arith.constant 0 : index
    %c0_11 = arith.constant 0 : index
    %c0_12 = arith.constant 0 : index
    %12 = vector.load %arg7[%c0_10, %c0_11, %c0_12] : memref<1x32x16xf32, #tpu.memory_space<vmem>>, vector<1x32x16xf32>
    %13 = vector.shape_cast %12 : vector<1x32x16xf32> to vector<32x16xf32>
    %cst_13 = arith.constant dense<0.000000e+00> : vector<8x16xf32>
    %14 = tpu.matmul %3, %13, %cst_13 {dimension_numbers = #tpu.dot_dimension_numbers<[1], [0], [0], [1], [0, 0, 1, 1], [], []>} : vector<8x32xf32>, vector<32x16xf32>, vector<8x16xf32> -> vector<8x16xf32>
    "tpu.trace_start"() <{level = 10 : i32, message = "nd,md->nm"}> : () -> ()
    %cst_14 = arith.constant dense<0.000000e+00> : vector<8x8xf32>
    %15 = tpu.matmul %8, %11, %cst_14 {dimension_numbers = #tpu.dot_dimension_numbers<[1], [1], [0], [0], [0, 0, 1, 0], [], []>} : vector<8x16xf32>, vector<8x16xf32>, vector<8x8xf32> -> vector<8x8xf32>
    "tpu.trace_stop"() : () -> ()
    %cst_15 = arith.constant dense<0xFF800000> : vector<8xf32>
    %16 = vector.multi_reduction <maximumf>, %15, %cst_15 [1] : vector<8x8xf32> to vector<8xf32>
    %17 = vector.shape_cast %16 : vector<8xf32> to vector<8x1xf32>
    %18 = vector.broadcast %17 : vector<8x1xf32> to vector<8x8xf32>
    %19 = arith.subf %15, %18 : vector<8x8xf32>
    %20 = math.exp %19 : vector<8x8xf32>
    %cst_16 = arith.constant dense<0.000000e+00> : vector<8xf32>
    %21 = vector.multi_reduction <add>, %20, %cst_16 [1] : vector<8x8xf32> to vector<8xf32>
    %22 = vector.shape_cast %21 : vector<8xf32> to vector<8x1xf32>
    %23 = tpu.reciprocal %22 {approx = true} : vector<8x1xf32> -> vector<8x1xf32>
    %24 = vector.broadcast %23 : vector<8x1xf32> to vector<8x8xf32>
    %25 = arith.mulf %20, %24 : vector<8x8xf32>
    %cst_17 = arith.constant dense<0.000000e+00> : vector<8x16xf32>
    %26 = tpu.matmul %25, %14, %cst_17 {dimension_numbers = #tpu.dot_dimension_numbers<[1], [0], [0], [1], [0, 0, 1, 1], [], []>} : vector<8x8xf32>, vector<8x16xf32>, vector<8x16xf32> -> vector<8x16xf32>
    %c0_18 = arith.constant 0 : index
    %c0_19 = arith.constant 0 : index
    %27 = vector.load %arg11[%c0_18, %c0_19] : memref<8x32xf32, #tpu.memory_space<vmem>>, vector<8x32xf32>
    %c0_20 = arith.constant 0 : index
    %c0_21 = arith.constant 0 : index
    %c0_22 = arith.constant 0 : index
    %28 = vector.load %arg8[%c0_20, %c0_21, %c0_22] : memref<1x16x32xf32, #tpu.memory_space<vmem>>, vector<1x16x32xf32>
    %29 = vector.shape_cast %28 : vector<1x16x32xf32> to vector<16x32xf32>
    %cst_23 = arith.constant dense<0.000000e+00> : vector<8x32xf32>
    %30 = tpu.matmul %26, %29, %cst_23 {dimension_numbers = #tpu.dot_dimension_numbers<[1], [0], [0], [1], [0, 0, 1, 1], [], []>} : vector<8x16xf32>, vector<16x32xf32>, vector<8x32xf32> -> vector<8x32xf32>
    %31 = arith.addf %27, %30 : vector<8x32xf32>
    %c0_24 = arith.constant 0 : index
    %c0_25 = arith.constant 0 : index
    %32 = vector.load %arg11[%c0_24, %c0_25] : memref<8x32xf32, #tpu.memory_space<vmem>>, vector<8x32xf32>
    tpu.vector_store %arg11[%c0_24, %c0_25], %31 {strides = array<i32>} : memref<8x32xf32, #tpu.memory_space<vmem>>, vector<8x32xf32>,
    %c1_i32 = arith.constant 1 : i32
    %33 = arith.cmpi eq, %arg1, %c1_i32 : i32
    %34 = arith.extui %33 : i1 to i32
    %c0_i32_26 = arith.constant 0 : i32
    %35 = arith.cmpi ne, %34, %c0_i32_26 : i32
    scf.if %35 {
      %c0_27 = arith.constant 0 : index
      %c0_28 = arith.constant 0 : index
      %36 = vector.load %arg11[%c0_27, %c0_28] : memref<8x32xf32, #tpu.memory_space<vmem>>, vector<8x32xf32>
      %c0_29 = arith.constant 0 : index
      %c0_30 = arith.constant 0 : index
      %c0_31 = arith.constant 0 : index
      %37 = vector.load %arg9[%c0_29, %c0_30, %c0_31] : memref<1x8x32xf32, #tpu.memory_space<vmem>>, vector<1x8x32xf32>
      %38 = vector.shape_cast %37 : vector<1x8x32xf32> to vector<8x32xf32>
      %39 = vector.shape_cast %36 : vector<8x32xf32> to vector<1x8x32xf32>
      tpu.vector_store %arg9[%c0_29, %c0_30, %c0_31], %39 {strides = array<i32>} : memref<1x8x32xf32, #tpu.memory_space<vmem>>, vector<1x8x32xf32>,
    } else {
    }
    return
  }
  func.func @transform_0(%arg0: i32, %arg1: i32) -> (i32, i32, i32) {
    %c0_i32 = arith.constant 0 : i32
    %c0_i32_0 = arith.constant 0 : i32
    %c0_i32_1 = arith.constant 0 : i32
    return %arg0, %c0_i32, %c0_i32_0 : i32, i32, i32
  }
  func.func @transform_1(%arg0: i32, %arg1: i32) -> (i32, i32) {
    %c0_i32 = arith.constant 0 : i32
    %c0_i32_0 = arith.constant 0 : i32
    %c0_i32_1 = arith.constant 0 : i32
    return %c0_i32, %c0_i32_0 : i32, i32
  }
  func.func @transform_2(%arg0: i32, %arg1: i32) -> (i32, i32) {
    %c0_i32 = arith.constant 0 : i32
    %c0_i32_0 = arith.constant 0 : i32
    %c0_i32_1 = arith.constant 0 : i32
    return %c0_i32, %c0_i32_0 : i32, i32
  }
  func.func @transform_3(%arg0: i32, %arg1: i32) -> (i32, i32, i32) {
    %c0_i32 = arith.constant 0 : i32
    %c0_i32_0 = arith.constant 0 : i32
    %c0_i32_1 = arith.constant 0 : i32
    return %arg1, %c0_i32, %c0_i32_0 : i32, i32, i32
  }
  func.func @transform_4(%arg0: i32, %arg1: i32) -> (i32, i32, i32) {
    %c0_i32 = arith.constant 0 : i32
    %c0_i32_0 = arith.constant 0 : i32
    %c0_i32_1 = arith.constant 0 : i32
    return %arg1, %c0_i32, %c0_i32_0 : i32, i32, i32
  }
  func.func @transform_5(%arg0: i32, %arg1: i32) -> (i32, i32, i32) {
    %c0_i32 = arith.constant 0 : i32
    %c0_i32_0 = arith.constant 0 : i32
    %c0_i32_1 = arith.constant 0 : i32
    return %arg1, %c0_i32, %c0_i32_0 : i32, i32, i32
  }
  func.func @transform_6(%arg0: i32, %arg1: i32) -> (i32, i32, i32) {
    %c0_i32 = arith.constant 0 : i32
    %c0_i32_0 = arith.constant 0 : i32
    %c0_i32_1 = arith.constant 0 : i32
    return %arg1, %c0_i32, %c0_i32_0 : i32, i32, i32
  }
  func.func @transform_7(%arg0: i32, %arg1: i32) -> (i32, i32, i32) {
    %c0_i32 = arith.constant 0 : i32
    %c0_i32_0 = arith.constant 0 : i32
    %c0_i32_1 = arith.constant 0 : i32
    return %arg0, %c0_i32, %c0_i32_0 : i32, i32, i32
  }
}

</mosaic_0001>

<bundles_post_ra>
// kernel: tpu_custom_call.1
= control target key start
LH: loop header
LB: loop body
LE: loop exit
PB: predicated region body
PF: predicated region fallthrough
CT: control target
= control target key end

     0   :  { %12 = vsyncpa [#allocation5], 0  ;;  %s1161_s0 = inlined_call_operand.vmem [shape: f32[2,8,32], index: 0, kind: input, shape index: {}]   ;;  %s1162_s1 = inlined_call_operand.vmem [shape: f32[1,32], index: 1, kind: input, shape index: {}]   ;;  %s1163_s2 = inlined_call_operand.vmem [shape: f32[1,32], index: 2, kind: input, shape index: {}]   ;;  %s1164_s3 = inlined_call_operand.vmem [shape: f32[2,32,16], index: 3, kind: input, shape index: {}]   ;;  %s1165_s4 = inlined_call_operand.vmem [shape: f32[2,32,16], index: 4, kind: input, shape index: {}]   ;;  %s1166_s5 = inlined_call_operand.vmem [shape: f32[2,32,16], index: 5, kind: input, shape index: {}]   ;;  %s1167_s6 = inlined_call_operand.vmem [shape: f32[2,16,32], index: 6, kind: input, shape index: {}]   ;;  %s1168_s7 = inlined_call_operand.hbm [shape: f32[2,8,32], index: 7, kind: output, shape index: {}]  }
   0x1   :  { %14 = vsyncpa [#allocation5 + $0x1], 0  ;;  %s974_s24 = smov 0   ;;  %s976_s25 = smov 0  }
   0x2   :  { %s978_s26 = smov 0   ;;  %s980_s27 = smov 0  }
   0x3   :  { %s982_s28 = smov 0   ;;  %s984_s29 = smov 0  }
   0x4   :  { %s986_s30 = smov 0   ;;  %s988_s8 = smov 0  }
   0x5 LB: > { %1176 = sst [smem:[#allocation7_spill]] %s902_s24  ;;  %s721_s9 = sadd.s32 4294967295, %s930_s8   ;;  %s930_s8 = sphi %s988_s8, %s20_s8   ;;  %s926_s30 = sphi %s986_s30, %s1197_s30   ;;  %s922_s29 = sphi %s984_s29, %s1193_s29   ;;  %s918_s28 = sphi %s982_s28, %s1192_s28   ;;  %s914_s27 = sphi %s980_s27, %s1191_s27   ;;  %s910_s26 = sphi %s978_s26, %s1190_s26   ;;  %s906_s25 = sphi %s976_s25, %s1196_s25   ;;  %s902_s24 = sphi %s974_s24, %s1195_s24  }
   0x6   : > { %1177 = sst [smem:[#allocation8_spill]] %s910_s26  ;;  %s722_s10 = sadd.s32 4294967294, %s930_s8  }
   0x7   : > { %1178 = sst [smem:[#allocation9_spill]] %s922_s29  ;;  %s29_s11 = sadd.s32 1, %s922_s29 }
   0x8   : > { %1179 = sst [smem:[#allocation10_spill]] %s926_s30  ;;  %p30_p0 = scmp.ge.s32.totalorder %s29_s11, 2 }
   0x9   : > { %s32_s12 = sadd.s32 1, %s926_s30  ;;  %p221_p1 = scmp.ne.s32.totalorder %s910_s26, %s906_s25 }
   0xa   : > { %p222_p2 = scmp.eq.s32.totalorder %s721_s9, 3  ;;  %s1199_s11 = smov (%p30_p0, %s29_s11), 0 }
   0xb   : > { %1180 = sst [smem:[#allocation11_spill]] %s1199_s11  ;;  %s1201_s12 = smov (!%p30_p0, %s32_s12), %s926_s30 }
   0xc   : > { %p1023_p3 = por %p222_p2, %p221_p1  ;;  %p227_p4 = scmp.ne.s32.totalorder %s906_s25, %s902_s24 }
   0xd   : > { %p34_p5 = scmp.ge.s32.totalorder %s1201_s12, 2  ;;  %p228_p6 = scmp.eq.s32.totalorder %s722_s10, 3 }
   0xe   : > { %p725_p7 = scmp.ge.s32.totalorder %s930_s8, 1  ;;  %p291_p8 = scmp.lt.s32.totalorder %s930_s8, 5 }
   0xf   : > { %s1203_s12 = smov (%p34_p5, %s1201_s12), 0  ;;  %p1033_p9 = por %p228_p6, %p227_p4 }
  0x10   : > { %1182 = sst [smem:[#allocation12_spill]] %s1203_s12  ;;  %p292_p10 = pnand %p725_p7, %p291_p8 }
  0x11   : > { %s1183_s14 = scalar_select %p1033_p9, 1, 0 }
  0x12   : > { %s208_s15 = ssub.s32 %s926_s30, %s1203_s12  ;;  %s211_s16 = sadd.s32 1, %s910_s26 }
  0x13   : > { %1184 = sst [smem:[#allocation13_spill]] %s1183_s14  ;;  %p209_p11 = scmp.eq.s32.totalorder %s208_s15, 0 }
  0x14   : > { %295 = sbr.rel (%p292_p10) target bundleno = 1109 (0x455), region = 48  ;;  %s1172_s18 = sand.u32 (!%p292_p10), 1, %s906_s25  }
  0x15   : > { %s1041_s17 = scalar_select %p209_p11, %s910_s26, %s211_s16  }
  0x16   : > { %p342_p12 = scmp.lt.s32.totalorder (!%p292_p10), %s918_s28, 1  ;;  %s1047_s19 = sshll.u32 (!%p292_p10), %s1172_s18, 3 }
  0x17   : > { %1185 = sst [smem:[#allocation14_spill]] %s1041_s17  ;;  %p346_p13 = scmp.lt.s32.totalorder (!%p292_p10), %s914_s27, 1 }
  0x18   : > { %s341_s9 = scalar_lea.vmem (!%p292_p10), [#allocation4], %s1047_s19  ;;  %p736_p0 = scmp.ne.s32.totalorder (!%p292_p10), %s914_s27, 0 }
  0x19   : > { %s343_s20 = scalar_select %p342_p12, %s918_s28, 1 }
  0x1a   : > { %s347_s21 = scalar_select %p346_p13, %s914_s27, 1 }
  0x1b   : > { %s727_s22 = sshll.u32 %s343_s20, 3  ;;  %369 = sbr.rel (%p736_p0) target bundleno = 302 (0x12e), region = 52 }
  0x1c   : > { %s345_s10 = scalar_lea.vmem %s1161_s0, %s727_s22  ;;  %s749_s15 = sshll.u32 %s347_s21, 5 }
  0x1d   : > { %s1058_s11 = scalar_lea.vmem %s1164_s3, %s749_s15  ;;  %s1063_s18 = scalar_lea.vmem %s1165_s4, %s749_s15 }
  0x1e   : > { %s1068_s14 = scalar_lea.vmem %s1166_s5, %s749_s15  ;;  %s752_s20 = sshll.u32 %s347_s21, 4 }
  0x1f   : > { %s1073_s22 = scalar_lea.vmem %s1167_s6, %s752_s20 }
  0x20   : > { %v370_v0 = vld [vmem:[%s345_s10] sm:$0xff]  ;;  %vm371_vm0 = vcmask 261120   ;;  %v932_v2 = vmov 0.0   ;;  %v933_v3 = vmov 32.0  }
  0x21   : > { %v372_v1 = vsel %vm371_vm0, %v370_v0, 0.0  ;;  %412 = vst.msk [vmem:[#allocation3] sm:$0xff] %vm371_vm0, %v932_v2  ;;  %828 = vrcp.f32 %v933_v3  ;;  %v826_v24 = vld [vmem:[%s1162_s1] ss:$0 sm:$0xff] }
  0x22   : > { %373 = vadd.xlane.f32.xlu0 %v372_v1  ;;  %v827_v26 = vld [vmem:[%s1163_s2] ss:$0 sm:$0xff] }
  0x27   : > { %v829_v4 = vpop.eup %828 }
  0x28   : > { %v376_v5 = vmul.f32 32.0, %v829_v4  ;;  %vm380_vm1 = vweird.f32 %v829_v4 }
  0x2a   : > { %v377_v6 = vsub.f32 1.0, %v376_v5 }
  0x2c   : > { %v378_v7 = vmul.f32 %v829_v4, %v377_v6 }
  0x2e   : > { %v379_v8 = vadd.f32 %v829_v4, %v378_v7 }
  0x30   : > { %v381_v9 = vsel %vm380_vm1, %v829_v4, %v379_v8 }
  0x95   : > { %v374_v10 = vpop.xlane.xlu0 %373 }
  0x96   : > { %v382_v11 = vmul.f32 %v381_v9, %v374_v10 }
  0x98   : > { %v383_v12 = vsub.f32 %v370_v0, %v382_v11 }
  0x9a   : > { %v384_v13 = vmul.f32 %v383_v12, %v383_v12 }
  0x9c   : > { %v385_v14 = vsel %vm371_vm0, %v384_v13, 0.0 }
  0x9d   : > { %386 = vadd.xlane.f32.xlu0 %v385_v14 }
 0x110   : > { %v387_v15 = vpop.xlane.xlu0 %386 }
 0x111   : > { %v388_v16 = vmul.f32 %v387_v15, %v381_v9 }
 0x113   : > { %v389_v17 = vadd.f32 1e-05, %v388_v16 }
 0x115   : > { %830 = vrsqrt.f32 %v389_v17  ;;  %vm396_vm3 = vweird.f32 %v389_v17 }
 0x11b   : > { %v831_v18 = vpop.eup %830 }
 0x11c   : > { %v391_v19 = vmul.f32 %v831_v18, %v389_v17  ;;  %vm397_vm2 = vweird.f32 %v831_v18 }
 0x11d   : > { %vm398_vm4 = vmor %vm396_vm3, %vm397_vm2 }
 0x11e   : > { %v392_v20 = vmul.f32 %v831_v18, %v391_v19 }
 0x120   : > { %v393_v21 = vmul.f32 0.5, %v392_v20 }
 0x122   : > { %v394_v22 = vsub.f32 1.5, %v393_v21 }
 0x124   : > { %v395_v23 = vmul.f32 %v831_v18, %v394_v22 }
 0x126   : > { %v399_v25 = vsel %vm398_vm4, %v831_v18, %v395_v23 }
 0x127   : > { %v400_v27 = vmul.f32 %v399_v25, %v383_v12 }
 0x129   : > { %v405_v28 = vmul.f32 %v826_v24, %v400_v27 }
 0x12b   : > { %v410_v29 = vadd.f32 %v827_v26, %v405_v28 }
 0x12d   : > { %411 = vst.msk [vmem:[#allocation2] sm:$0xff] %vm371_vm0, %v410_v29 }
 0x12e PF: > { %v446_v30 = vld [vmem:[%s1063_s18 + $0x18] sm:$0xff]  ;;  %v445_v32 = vld [vmem:[%s1063_s18 + $0x10] sm:$0xff]  ;;  %v444_v34 = vld [vmem:[%s1063_s18 + $0x8] sm:$0xff]  ;;  %vm418_vm5 = vcmask 261120   ;;  %vm491_vm6 = vcmask 130048   ;;  %vm518_vm7 = vcmask 64512  }
 0x12f   : > { %v417_v31 = vld [vmem:[%s1058_s11 + $0x18] sm:$0xff]  ;;  %459 = vmatpush.msra.mxu1 %v446_v30  ;;  %v416_v33 = vld [vmem:[%s1058_s11 + $0x10] sm:$0xff]  ;;  %v415_v35 = vld [vmem:[%s1058_s11 + $0x8] sm:$0xff]  ;;  %p744_p1 = scmp.ne.s32.totalorder %s914_s27, 1 }
 0x130   : > { %434 = vmatpush.msra.mxu0 %v417_v31  ;;  %v443_v36 = vld [vmem:[%s1063_s18] sm:$0xff]  ;;  %v470_v42 = vld [vmem:[%s1068_s14 + $0x18] sm:$0xff]  ;;  %v469_v43 = vld [vmem:[%s1068_s14 + $0x10] sm:$0xff] }
 0x131   : > { %460 = vmatpush.msra.mxu1 %v445_v32  ;;  %v414_v37 = vld [vmem:[%s1058_s11] sm:$0xff]  ;;  %483 = vmatpush.msra.mxu2 %v470_v42  ;;  %v468_v44 = vld [vmem:[%s1068_s14 + $0x8] sm:$0xff] }
 0x132   : > { %435 = vmatpush.msra.mxu0 %v416_v33  ;;  %v467_v45 = vld [vmem:[%s1068_s14] sm:$0xff]  ;;  %v555_v54 = vld [vmem:[%s1073_s22 + $0x8] sm:$0xff] }
 0x133   : > { %461 = vmatpush.msra.mxu1 %v444_v34  ;;  %484 = vmatpush.msra.mxu2 %v469_v43  ;;  %v554_v55 = vld [vmem:[%s1073_s22] sm:$0xff]  ;;  %v553_v60 = vld [vmem:[#allocation3] sm:$0xff] }
 0x134   : > { %436 = vmatpush.msra.mxu0 %v415_v35  ;;  %v413_v38 = vld [vmem:[#allocation2] sm:$0xff] }
 0x135   : > { %462 = vmatpush.msra.mxu1 %v443_v36  ;;  %485 = vmatpush.msra.mxu2 %v468_v44 }
 0x136   : > { %437 = vmatpush.msra.mxu0 %v414_v37  ;;  %738 = vmatmul.msk.f32.vlgmr.msra.gmra.mxu1 %vm418_vm5, %v413_v38 }
 0x137   : > { %737 = vmatmul.msk.f32.vlgmr.msra.gmra.mxu0 %vm418_vm5, %v413_v38  ;;  %486 = vmatpush.msra.mxu2 %v467_v45 }
 0x138   : > { %739 = vmatmul.msk.f32.vlgmr.msra.gmra.mxu2 %vm418_vm5, %v413_v38  ;;  %573 = vmatpush.msrb.mxu0 %v555_v54 }
 0x13a   : > { %574 = vmatpush.msrb.mxu0 %v554_v55 }
 0x1b3   : > { %v464_v39 = vpop.f32.mrf.mxu1 }
 0x1b4   : > { %v439_v40 = vpop.f32.mrf.mxu0  ;;  %740 = vmatpush.xpose.msk.msra.mxu3 %vm491_vm6, %v464_v39 }
 0x1b5   : > { %v442_v41 = vmul.f32 0.25, %v439_v40 }
 0x1b7   : > { %741 = vmatmul.msk.f32.vlgmr.msra.gmra.mxu3 %vm491_vm6, %v442_v41 }
 0x1bb   : > { %v488_v53 = vpop.f32.mrf.mxu2 }
 0x1bc   : > { %548 = vmatpush.msrb.mxu3 %v488_v53 }
 0x23a   : > { %v515_v46 = vpop.f32.mrf.mxu3 }
 0x23b   : > { %v519_v47 = vsel %vm518_vm7, %v515_v46, -inf }
 0x23c   : > { %520 = vmax.xlane.f32.xlu0 %v519_v47 }
 0x2af   : > { %v521_v48 = vpop.xlane.xlu0 %520 }
 0x2b0   : > { %v522_v49 = vsub.f32 %v515_v46, %v521_v48 }
 0x2b2   : > { %v523_v50 = vmul.f32 1.442695, %v522_v49 }
 0x2b4   : > { %832 = vpow2.f32 %v523_v50 }
 0x2ba   : > { %v833_v51 = vpop.eup %832 }
 0x2bb   : > { %v525_v52 = vsel %vm518_vm7, %v833_v51, 0.0 }
 0x2bc   : > { %526 = vadd.xlane.f32.xlu0 %v525_v52 }
 0x32f   : > { %v527_v56 = vpop.xlane.xlu0 %526 }
 0x330   : > { %834 = vrcp.f32 %v527_v56 }
 0x336   : > { %v835_v57 = vpop.eup %834 }
 0x337   : > { %v529_v58 = vmul.f32 %v835_v57, %v833_v51 }
 0x339   : > { %742 = vmatmul.msk.f32.vlgmr.msrb.gmra.mxu3 %vm518_vm7, %v529_v58 }
 0x3bc   : > { %v550_v59 = vpop.f32.mrf.mxu3 }
 0x3bd   : > { %743 = vmatmul.msk.f32.vlgmr.msrb.gmra.mxu0 %vm491_vm6, %v550_v59 }
 0x439   : > { %584 = sbr.rel (%p744_p1) target bundleno = 1094 (0x446), region = 56 }
 0x43a   : > { %v576_v61 = vpop.f32.mrf.mxu0 }
 0x43b   : > { %v579_v62 = vadd.f32 %v576_v61, %v553_v60 }
 0x43d   : > { %580 = vst.msk [vmem:[#allocation3] sm:$0xff] %vm418_vm5, %v579_v62 }
 0x444   : > { %v585_v63 = vld [vmem:[#allocation3] sm:$0xff] }
 0x445   : > { %586 = vst.msk [vmem:[%s341_s9] sm:$0xff] %vm418_vm5, %v585_v63 }
 0x446 PF: > { %s746_s11 = sshll.u32 %s918_s28, 3  ;;  %s600_s18 = sshll.u32 %s341_s9, 4  ;;  %s601_s18 = int_to_ptr.vmem [resolvable:$true] %s600_s18 }
 0x447   : > { %s598_s17 = scalar_lea.hbm %s1168_s7, %s746_s11  ;;  %s1186_s21 = sand.u32 1, %s906_s25  }
 0x448   : > { %s602_s27 = sshll.u32 %s598_s17, 4  ;;  %s588_s10 = scalar_lea.sflag [#allocation5], %s1186_s21  ;;  %s603_s27 = int_to_ptr.hbm [resolvable:$true] %s602_s27 }
 0x449   : > { %s850_s15 = sshra.s32 %s603_s27, 4  ;;  %s856_s23 = scalar_lea.hbm %s1168_s7, 16  ;;  %s851_s15 = int_to_ptr.hbm [resolvable:$true] %s850_s15 }
 0x44a   : > { %s852_s16 = scalar_lea.hbm %s851_s15, 8  ;;  %p857_p6 = scmp.lt.s32.totalorder %s851_s15, %s1168_s7 }
 0x44b   : > { %p853_p2 = scmp.ne.s32.totalorder %s851_s15, %s852_s16  ;;  %p858_p7 = scmp.lt.s32.totalorder %s856_s23, %s852_s16 }
 0x44d   : > { %p854_p4 = pnand %p853_p2, %p1023_p3  ;;  %p859_p8 = por %p858_p7, %p857_p6 }
 0x44f   : > { %p855_p5 = pneg %p854_p4 }
 0x451   : > { %p860_p10 = pnand %p859_p8, %p855_p5 }
 0x453   : > { %863 = shalt.err (!%p860_p10)
}
 0x454   : > { %753 = dma.vmem_to_hbm [thread:$0]  (%p1023_p3), %s601_s18, 128, %s603_s27, %s588_s10  }
 0x455 PF: > { %s1187_s19 = sld [smem:[#allocation7_spill]]  ;;  %p759_p11 = scmp.ge.s32.totalorder %s930_s8, 2 }
 0x457   : > { %p756_p12 = pnand %p759_p11, %p1033_p9 }
 0x459   : > { %p757_p13 = pneg %p756_p12 }
 0x45b   : > { %s614_s26 = sand.u32 1, %s1187_s19  }
 0x45c   : > { %s615_s29 = scalar_lea.sflag [#allocation5], %s614_s26 }
 0x45d   : > { %897 = dma.done.wait (%p757_p13), %s615_s29, 128  }
 0x45e   : > { %899 = vsyncadd (%p757_p13), %s615_s29, 4294967168  ;;  %s20_s8 = sadd.s32 1, %s930_s8   ;;  %s1189_s30 = sld [smem:[#allocation8_spill]] }
 0x45f   : > { %p17_p0 = scmp.ge.s32.totalorder %s20_s8, 6   ;;  %s1190_s26 = sld [smem:[#allocation14_spill]] }
 0x460   : > { %s1191_s27 = sld [smem:[#allocation9_spill]]  ;;  %s1195_s24 = smov %s906_s25 }
 0x461   : > { %s1192_s28 = sld [smem:[#allocation10_spill]] }
 0x462   : > { %s1193_s29 = sld [smem:[#allocation11_spill]] }
 0x463   : > { %s1194_s13 = sld [smem:[#allocation12_spill]] }
 0x464   : > { %s1196_s25 = smov %s1189_s30 }
 0x465   :  { %19 = sbr.rel (!%p17_p0) target bundleno = 5 (0x5), region = 103 }
 0x469   : > { %s1197_s30 = smov %s1194_s13 }
 0x46a   :  { %621 = vsyncpa [#allocation5], 1 }
 0x46b   :  { %623 = vsyncpa [#allocation5 + $0x1], 1 }

</bundles_post_ra>
